<compile_context>
chip_gen: v7x
topology: tpu7x:2x2x1
jax: 0.10.0
libtpu: 0.0.40
codegen_flags: <defaults>
</compile_context>

<pallas_src>
import functools

import jax
import jax.numpy as jnp
from jax.experimental import pallas as pl
from jax.experimental.pallas import tpu as pltpu


def _round_up(x, m):
    return ((x + m - 1) // m) * m


def adapter_kernel(alpha_ref, x_ref, emb_ref, w1_ref, b1_ref, w2_ref, b2_ref,
                   o_ref):
    """One batch tile of the adapter MLP + learnable residual blend.

    alpha_ref : SMEM (1,)            learnable residual alpha (scalar prefetch)
    x_ref     : VMEM (TB, F_in)      concatenated inputs (bf16 or f32)
    emb_ref   : VMEM (TB, E)         original embeddings (f32)
    w1_ref    : VMEM (F_in, H)       hidden Linear weight, transposed (bf16/f32)
    b1_ref    : VMEM (1, H)          hidden Linear bias (f32)
    w2_ref    : VMEM (H, E)          output Linear weight, transposed (bf16/f32)
    b2_ref    : VMEM (1, E)          output Linear bias (f32)
    o_ref     : VMEM (TB, E)         result (f32)
    """
    alpha = alpha_ref[0]  # hoisted scalar read (SMEM)

    # Hidden layer: Linear -> ReLU. MXU matmul, f32 accumulate; elementwise f32.
    h = jnp.dot(x_ref[...], w1_ref[...], preferred_element_type=jnp.float32)
    h = jnp.maximum(h + b1_ref[...], 0.0)

    # Output layer: Linear (activations re-cast to the weight dtype for MXU).
    out = jnp.dot(h.astype(w2_ref.dtype), w2_ref[...],
                  preferred_element_type=jnp.float32) + b2_ref[...]

    # Learnable residual: alpha*out + (1-alpha)*emb  ==  emb + alpha*(out - emb)
    emb = emb_ref[...]
    o_ref[...] = emb + alpha * (out - emb)


@functools.partial(jax.jit, static_argnames=("tile_b", "use_bf16"))
def clip_adapter_forward(inputs, embeddings, w1, b1, w2, b2, alpha,
                         *, tile_b=512, use_bf16=True):
    """Casts to f32 (as in the PyTorch forward), tiles the batch, launches Pallas."""
    x = inputs.astype(jnp.float32)
    emb = embeddings.astype(jnp.float32)
    B, F_in = x.shape
    E = emb.shape[1]
    H = w1.shape[1]

    # Batch tile: multiple of 8 sublanes, capped at tile_b; pad batch up to a
    # whole number of tiles (padded rows are sliced off below).
    tb = min(_round_up(tile_b, 8), _round_up(B, 8))
    pB = _round_up(B, tb)
    if pB != B:
        x = jnp.pad(x, ((0, pB - B), (0, 0)))
        emb = jnp.pad(emb, ((0, pB - B), (0, 0)))

    mm_dtype = jnp.bfloat16 if use_bf16 else jnp.float32
    x_mm = x.astype(mm_dtype)
    w1_mm = w1.astype(mm_dtype)
    w2_mm = w2.astype(mm_dtype)
    b1_2d = b1.reshape(1, H).astype(jnp.float32)
    b2_2d = b2.reshape(1, E).astype(jnp.float32)
    alpha_smem = jnp.asarray(alpha, jnp.float32).reshape(1)

    grid = (pB // tb,)
    grid_spec = pltpu.PrefetchScalarGridSpec(
        num_scalar_prefetch=1,          # alpha -> SMEM, passed to index_maps
        grid=grid,
        in_specs=[
            pl.BlockSpec((tb, F_in), lambda i, a: (i, 0)),   # x tile
            pl.BlockSpec((tb, E),    lambda i, a: (i, 0)),   # emb tile
            pl.BlockSpec((F_in, H),  lambda i, a: (0, 0)),   # w1 (VMEM-resident)
            pl.BlockSpec((1, H),     lambda i, a: (0, 0)),   # b1 (VMEM-resident)
            pl.BlockSpec((H, E),     lambda i, a: (0, 0)),   # w2 (VMEM-resident)
            pl.BlockSpec((1, E),     lambda i, a: (0, 0)),   # b2 (VMEM-resident)
        ],
        out_specs=pl.BlockSpec((tb, E), lambda i, a: (i, 0)),
    )

    out = pl.pallas_call(
        adapter_kernel,
        out_shape=jax.ShapeDtypeStruct((pB, E), jnp.float32),
        grid_spec=grid_spec,
        compiler_params=pltpu.CompilerParams(
            dimension_semantics=("parallel",),   # shard batch tiles across TCs (v7x)
            vmem_limit_bytes=32 * 1024 * 1024,   # ample headroom on v5e/v6e/v7x
        ),
    )(alpha_smem, x_mm, emb, w1_mm, b1_2d, w2_mm, b2_2d)

    return out[:B] if pB != B else out


def reference_forward(inputs, embeddings, w1, b1, w2, b2, alpha,
                      mm_dtype=jnp.float32):
    """Plain-JAX reference of the same forward pass (for sanity checking)."""
    x = inputs.astype(jnp.float32)
    emb = embeddings.astype(jnp.float32)
    h = jnp.dot(x.astype(mm_dtype), w1.astype(mm_dtype),
                preferred_element_type=jnp.float32) + b1
    h = jnp.maximum(h, 0.0)
    out = jnp.dot(h.astype(mm_dtype), w2.astype(mm_dtype),
                  preferred_element_type=jnp.float32) + b2
    a = jnp.float32(alpha)
    return a * out + (1.0 - a) * emb


if __name__ == "__main__":
    # --- synthetic config -------------------------------------------------
    batch = 40                        # deliberately not a tile multiple
    embedding_size = 32
    inter_size = 16
    num_layers_to_use_for_adapter = 2
    init_size = embedding_size + 2 * num_layers_to_use_for_adapter * inter_size  # 96
    hidden_size = int(round(0.5 * init_size))                                    # 48

    # --- deterministic parameter / input construction ---------------------
    key = jax.random.PRNGKey(0)
    k_x, k_e, k_w1, k_b1, k_w2, k_b2 = jax.random.split(key, 6)

    inputs = jax.random.normal(k_x, (batch, init_size), dtype=jnp.float32)
    embeddings = jax.random.normal(k_e, (batch, embedding_size), dtype=jnp.float32)

    # nn.Linear-style init, stored already transposed to (in, out).
    s1 = 1.0 / jnp.sqrt(jnp.float32(init_size))
    s2 = 1.0 / jnp.sqrt(jnp.float32(hidden_size))
    w1 = jax.random.uniform(k_w1, (init_size, hidden_size), jnp.float32, -s1, s1)
    b1 = jax.random.uniform(k_b1, (hidden_size,), jnp.float32, -s1, s1)
    w2 = jax.random.uniform(k_w2, (hidden_size, embedding_size), jnp.float32, -s2, s2)
    b2 = jax.random.uniform(k_b2, (embedding_size,), jnp.float32, -s2, s2)

    # residual_alpha parameter (learnable residual type), initialised to 0.5
    alpha = jnp.float32(0.5)

    # --- run kernel (small tile to exercise the grid + padding path) -------
    out = clip_adapter_forward(inputs, embeddings, w1, b1, w2, b2, alpha,
                               tile_b=16)
    out = jax.block_until_ready(out)
    assert out.shape == (batch, embedding_size)

    # Matched-precision reference (bf16 matmul operands, f32 accumulate).
    ref_bf16 = reference_forward(inputs, embeddings, w1, b1, w2, b2, alpha,
                                 mm_dtype=jnp.bfloat16)
    assert jnp.allclose(out, ref_bf16, atol=1e-4, rtol=1e-4), \
        float(jnp.max(jnp.abs(out - ref_bf16)))

    # Full-f32 PyTorch-equivalent reference (loose tolerance for bf16 operands).
    ref_f32 = reference_forward(inputs, embeddings, w1, b1, w2, b2, alpha)
    assert jnp.allclose(out, ref_f32, atol=3e-2, rtol=3e-2), \
        float(jnp.max(jnp.abs(out - ref_f32)))

    # Also exercise the default (large-tile, no-padding-needed) path once.
    out2 = jax.block_until_ready(
        clip_adapter_forward(inputs, embeddings, w1, b1, w2, b2, alpha))
    assert jnp.allclose(out2, ref_bf16, atol=1e-4, rtol=1e-4)

    print("KERNEL_OK")
</pallas_src>

<mosaic_0001>
module attributes {stable_mosaic.version = 11 : i64} {
  func.func @adapter_kernel(%arg0: i32, %arg1: memref<1xf32, #tpu.memory_space<smem>>, %arg2: memref<16x96xbf16, #tpu.memory_space<vmem>>, %arg3: memref<16x32xf32, #tpu.memory_space<vmem>>, %arg4: memref<96x48xbf16, #tpu.memory_space<vmem>>, %arg5: memref<1x48xf32, #tpu.memory_space<vmem>>, %arg6: memref<48x32xbf16, #tpu.memory_space<vmem>>, %arg7: memref<1x32xf32, #tpu.memory_space<vmem>>, %arg8: memref<16x32xf32, #tpu.memory_space<vmem>>) attributes {dimension_semantics = [#tpu.dimension_semantics<parallel>], iteration_bounds = array<i64: 3>, scalar_prefetch = 1 : i64, scratch_operands = 0 : i64, tpu.core_type = #tpu.core_type<tc>, window_params = [{transform_indices = @transform_0, window_bounds = array<i64: 16, 96>}, {transform_indices = @transform_1, window_bounds = array<i64: 16, 32>}, {pipeline_mode = #tpu.pipeline_mode<synchronous>, transform_indices = @transform_2, window_bounds = array<i64: 96, 48>}, {pipeline_mode = #tpu.pipeline_mode<synchronous>, transform_indices = @transform_3, window_bounds = array<i64: 1, 48>}, {pipeline_mode = #tpu.pipeline_mode<synchronous>, transform_indices = @transform_4, window_bounds = array<i64: 48, 32>}, {pipeline_mode = #tpu.pipeline_mode<synchronous>, transform_indices = @transform_5, window_bounds = array<i64: 1, 32>}, {transform_indices = @transform_6, window_bounds = array<i64: 16, 32>}]} {
    %c0 = arith.constant 0 : index
    %0 = memref.load %arg1[%c0] : memref<1xf32, #tpu.memory_space<smem>>
    %c0_0 = arith.constant 0 : index
    %c0_1 = arith.constant 0 : index
    %1 = vector.load %arg2[%c0_0, %c0_1] : memref<16x96xbf16, #tpu.memory_space<vmem>>, vector<16x96xbf16>
    %c0_2 = arith.constant 0 : index
    %c0_3 = arith.constant 0 : index
    %2 = vector.load %arg4[%c0_2, %c0_3] : memref<96x48xbf16, #tpu.memory_space<vmem>>, vector<96x48xbf16>
    %cst = arith.constant dense<0.000000e+00> : vector<16x48xf32>
    %3 = tpu.matmul %1, %2, %cst {dimension_numbers = #tpu.dot_dimension_numbers<[1], [0], [0], [1], [0, 0, 1, 1], [], []>} : vector<16x96xbf16>, vector<96x48xbf16>, vector<16x48xf32> -> vector<16x48xf32>
    %c0_4 = arith.constant 0 : index
    %c0_5 = arith.constant 0 : index
    %4 = vector.load %arg5[%c0_4, %c0_5] : memref<1x48xf32, #tpu.memory_space<vmem>>, vector<1x48xf32>
    %5 = vector.broadcast %4 : vector<1x48xf32> to vector<16x48xf32>
    %6 = arith.addf %3, %5 : vector<16x48xf32>
    %cst_6 = arith.constant 0.000000e+00 : f32
    %7 = vector.broadcast %cst_6 : f32 to vector<16x48xf32>
    %8 = arith.maximumf %6, %7 : vector<16x48xf32>
    %9 = arith.truncf %8 : vector<16x48xf32> to vector<16x48xbf16>
    %c0_7 = arith.constant 0 : index
    %c0_8 = arith.constant 0 : index
    %10 = vector.load %arg6[%c0_7, %c0_8] : memref<48x32xbf16, #tpu.memory_space<vmem>>, vector<48x32xbf16>
    %cst_9 = arith.constant dense<0.000000e+00> : vector<16x32xf32>
    %11 = tpu.matmul %9, %10, %cst_9 {dimension_numbers = #tpu.dot_dimension_numbers<[1], [0], [0], [1], [0, 0, 1, 1], [], []>} : vector<16x48xbf16>, vector<48x32xbf16>, vector<16x32xf32> -> vector<16x32xf32>
    %c0_10 = arith.constant 0 : index
    %c0_11 = arith.constant 0 : index
    %12 = vector.load %arg7[%c0_10, %c0_11] : memref<1x32xf32, #tpu.memory_space<vmem>>, vector<1x32xf32>
    %13 = vector.broadcast %12 : vector<1x32xf32> to vector<16x32xf32>
    %14 = arith.addf %11, %13 : vector<16x32xf32>
    %c0_12 = arith.constant 0 : index
    %c0_13 = arith.constant 0 : index
    %15 = vector.load %arg3[%c0_12, %c0_13] : memref<16x32xf32, #tpu.memory_space<vmem>>, vector<16x32xf32>
    %16 = arith.subf %14, %15 : vector<16x32xf32>
    %17 = vector.broadcast %0 : f32 to vector<16x32xf32>
    %18 = arith.mulf %17, %16 : vector<16x32xf32>
    %19 = arith.addf %15, %18 : vector<16x32xf32>
    %c0_14 = arith.constant 0 : index
    %c0_15 = arith.constant 0 : index
    %20 = vector.load %arg8[%c0_14, %c0_15] : memref<16x32xf32, #tpu.memory_space<vmem>>, vector<16x32xf32>
    tpu.vector_store %arg8[%c0_14, %c0_15], %19 {strides = array<i32>} : memref<16x32xf32, #tpu.memory_space<vmem>>, vector<16x32xf32>,
    return
  }
  func.func @transform_0(%arg0: i32, %arg1: memref<1xf32, #tpu.memory_space<smem>>) -> (i32, i32) {
    %c0_i32 = arith.constant 0 : i32
    %c0_i32_0 = arith.constant 0 : i32
    return %arg0, %c0_i32 : i32, i32
  }
  func.func @transform_1(%arg0: i32, %arg1: memref<1xf32, #tpu.memory_space<smem>>) -> (i32, i32) {
    %c0_i32 = arith.constant 0 : i32
    %c0_i32_0 = arith.constant 0 : i32
    return %arg0, %c0_i32 : i32, i32
  }
  func.func @transform_2(%arg0: i32, %arg1: memref<1xf32, #tpu.memory_space<smem>>) -> (i32, i32) {
    %c0_i32 = arith.constant 0 : i32
    %c0_i32_0 = arith.constant 0 : i32
    %c0_i32_1 = arith.constant 0 : i32
    return %c0_i32, %c0_i32_0 : i32, i32
  }
  func.func @transform_3(%arg0: i32, %arg1: memref<1xf32, #tpu.memory_space<smem>>) -> (i32, i32) {
    %c0_i32 = arith.constant 0 : i32
    %c0_i32_0 = arith.constant 0 : i32
    %c0_i32_1 = arith.constant 0 : i32
    return %c0_i32, %c0_i32_0 : i32, i32
  }
  func.func @transform_4(%arg0: i32, %arg1: memref<1xf32, #tpu.memory_space<smem>>) -> (i32, i32) {
    %c0_i32 = arith.constant 0 : i32
    %c0_i32_0 = arith.constant 0 : i32
    %c0_i32_1 = arith.constant 0 : i32
    return %c0_i32, %c0_i32_0 : i32, i32
  }
  func.func @transform_5(%arg0: i32, %arg1: memref<1xf32, #tpu.memory_space<smem>>) -> (i32, i32) {
    %c0_i32 = arith.constant 0 : i32
    %c0_i32_0 = arith.constant 0 : i32
    %c0_i32_1 = arith.constant 0 : i32
    return %c0_i32, %c0_i32_0 : i32, i32
  }
  func.func @transform_6(%arg0: i32, %arg1: memref<1xf32, #tpu.memory_space<smem>>) -> (i32, i32) {
    %c0_i32 = arith.constant 0 : i32
    %c0_i32_0 = arith.constant 0 : i32
    return %arg0, %c0_i32 : i32, i32
  }
}

</mosaic_0001>

<bundles_post_ra>
// kernel: clip_adapter_forward.1
= control target key start
LH: loop header
LB: loop body
LE: loop exit
PB: predicated region body
PF: predicated region fallthrough
CT: control target
= control target key end

     0   :  { %s684_s26 = smov 0   ;;  %s741_s0 = inlined_call_operand.<no memory space> [shape: f32[1], index: 0, kind: input, shape index: {}]   ;;  %s742_s1 = inlined_call_operand.vmem [shape: bf16[48,96], index: 1, kind: input, shape index: {}]   ;;  %s743_s2 = inlined_call_operand.vmem [shape: f32[48,32], index: 2, kind: input, shape index: {}]   ;;  %s744_s3 = inlined_call_operand.vmem [shape: bf16[96,48], index: 3, kind: input, shape index: {}]   ;;  %s745_s4 = inlined_call_operand.vmem [shape: f32[1,48], index: 4, kind: input, shape index: {}]   ;;  %s746_s5 = inlined_call_operand.vmem [shape: bf16[48,32], index: 5, kind: input, shape index: {}]   ;;  %s747_s6 = inlined_call_operand.vmem [shape: f32[1,32], index: 6, kind: input, shape index: {}]   ;;  %s748_s7 = inlined_call_operand.vmem [shape: f32[48,32], index: 7, kind: output, shape index: {}]  }
   0x1   :  { %12 = sst [smem:[#allocation3]] %s741_s0 }
   0x2 LB: > { %s547_s27 = sadd.s32 4294967295, %s637_s26   ;;  %p551_p0 = scmp.ge.s32.totalorder %s637_s26, 1  ;;  %s637_s26 = sphi %s684_s26, %s18_s26  }
   0x3   : > { %p226_p1 = scmp.lt.s32.totalorder %s637_s26, 4 }
   0x5   : > { %p227_p2 = pnand %p551_p0, %p226_p1 }
   0x6   : > { %v621_v0 = vld [vmem:[%s744_s3] sm:$0xff] (!%p227_p2)   ;;  %v639_v1 = vmov (!%p227_p2), 0.0   ;;  %v622_v2 = vld [vmem:[%s744_s3 + $0x8] sm:$0xff] (!%p227_p2)   ;;  %vm640_vm0 = vmmov (!%p227_p2), 0   ;;  %s552_s8 = sshll.u32 (!%p227_p2), %s547_s27, 1  ;;  %v623_v3 = vld [vmem:[%s744_s3 + $0x10] sm:$0xff] (!%p227_p2)  }
   0x7   : > { %230 = sbr.rel (%p227_p2) target bundleno = 474 (0x1da), region = 44  ;;  %585 = vmatprep.subr.bf16.mxu0 (!%p227_p2), %v639_v1  ;;  %601 = vmatprep.subr.bf16.mxu1 (!%p227_p2), %v639_v1  ;;  %p262_p3 = scmp.lt.s32.totalorder (!%p227_p2), %s552_s8, 5  ;;  %v628_v4 = vld [vmem:[%s746_s5] sm:$0xff] (!%p227_p2)   ;;  %v624_v5 = vld [vmem:[%s744_s3 + $0x18] sm:$0xff] (!%p227_p2)   ;;  %v626_v7 = vld [vmem:[%s744_s3 + $0x28] sm:$0xff] (!%p227_p2)   ;;  %vm343_vm1 = vcmask (!%p227_p2), 785408  }
   0x8   : > { %586 = vmatpush3.bf16.msra.mxu0 (!%p227_p2), %v621_v0  ;;  %597 = vmatprep.mubr.msk.bf16.mxu0 (!%p227_p2), %vm640_vm0, %v639_v1  ;;  %v625_v6 = vld [vmem:[%s744_s3 + $0x20] sm:$0xff] (!%p227_p2)   ;;  %v629_v9 = vld [vmem:[%s746_s5 + $0x8] sm:$0xff] (!%p227_p2)   ;;  %v630_v10 = vld [vmem:[%s746_s5 + $0x10] sm:$0xff] (!%p227_p2)   ;;  %vm422_vm2 = vcmask (!%p227_p2), 392192   ;;  %s280_s30 = sld [smem:[#allocation3]] (!%p227_p2)  ;;  %vm476_vm3 = vcmask (!%p227_p2), 261120  }
   0x9   : > { %587 = vmatprep.subr.bf16.mxu0 (!%p227_p2), %v639_v1  ;;  %607 = vmatprep.mubr.msk.bf16.mxu1 (!%p227_p2), %vm640_vm0, %v639_v1  ;;  %v558_v11 = vld [vmem:[%s745_s4] ss:$0 sm:$0xff] (!%p227_p2) }
   0xa   : > { %602 = vmatpush3.bf16.msra.mxu1 (!%p227_p2), %v628_v4  ;;  %v567_v21 = vld [vmem:[%s747_s6] ss:$0 sm:$0xff] (!%p227_p2) }
   0xb   : > { %603 = vmatprep.subr.bf16.mxu1 (!%p227_p2), %v639_v1 }
   0xc   : > { %588 = vmatpush3.bf16.msra.mxu0 (!%p227_p2), %v622_v2 }
   0xd   : > { %589 = vmatprep.subr.bf16.mxu0 (!%p227_p2), %v639_v1 }
   0xe   : > { %s750_s8 = smov (!%p262_p3, %s552_s8), 5  ;;  %604 = vmatpush3.bf16.msra.mxu1 %v629_v9  ;;  %v471_v26 = vstv %s280_s30 }
   0xf   : > { %s553_s13 = sshll.u32 %s750_s8, 2  ;;  %605 = vmatprep.subr.bf16.mxu1 %v639_v1  ;;  %s555_s0 = sshll.u32 %s750_s8, 3 }
  0x10   : > { %s265_s16 = scalar_lea.vmem %s742_s1, %s553_s13  ;;  %590 = vmatpush3.bf16.msra.mxu0 %v623_v3  ;;  %s271_s11 = scalar_lea.vmem %s743_s2, %s555_s0 }
  0x11   : > { %591 = vmatprep.subr.bf16.mxu0 %v639_v1  ;;  %v627_v8 = vld [vmem:[%s265_s16] sm:$0xff]   ;;  %v468_v28 = vld [vmem:[%s271_s11 + $0x8] sm:$0xff]  ;;  %s277_s15 = scalar_lea.vmem %s748_s7, %s555_s0 }
  0x12   : > { %606 = vmatpush3.bf16.msra.mxu1 %v630_v10  ;;  %v467_v23 = vld [vmem:[%s271_s11] sm:$0xff] }
  0x14   : > { %592 = vmatpush3.bf16.msra.mxu0 %v624_v5 }
  0x15   : > { %593 = vmatprep.subr.bf16.mxu0 %v639_v1 }
  0x18   : > { %594 = vmatpush3.bf16.msra.mxu0 %v625_v6 }
  0x19   : > { %595 = vmatprep.subr.bf16.mxu0 %v639_v1 }
  0x1c   : > { %596 = vmatpush3.bf16.msra.mxu0 %v626_v7 }
  0x1f   : > { %598 = vmatmul.mubr.msk.bf16.vlgmr.msra.gmra.mrb[0].mxu0 %vm343_vm1, %v627_v8 }
  0xf2   : > { %v381_v12 = vpop.f32.mrb[0].mxu0 }
  0xf3   : > { %v382_v13 = vadd.f32 %v558_v11, %v381_v12  ;;  %v599_v14 = vpop.f32.mrb[1].mxu0 }
  0xf4   : > { %v384_v15 = vpop.f32.mrb[2].mxu0 }
  0xf5   : > { %v385_v16 = vadd.f32 %v558_v11, %v384_v15  ;;  %v600_v17 = vpop.f32.mrb[3].mxu0  ;;  %v388_v18 = vmax.f32 %v382_v13, 0.0 }
  0xf7   : > { %v389_v19 = vmax.f32 %v385_v16, 0.0 }
  0xf9   : > { %v390_v20 = vpack.c.bf16 %v389_v19, %v388_v18 }
  0xfb   : > { %608 = vmatmul.mubr.msk.bf16.vlgmr.msra.gmra.mrb[0].mxu1 %vm422_vm2, %v390_v20 }
 0x1ce   : > { %v460_v22 = vpop.f32.mrb[0].mxu1 }
 0x1cf   : > { %v461_v24 = vadd.f32 %v567_v21, %v460_v22  ;;  %v609_v25 = vpop.f32.mrb[1].mxu1 }
 0x1d0   : > { %v463_v27 = vpop.f32.mrb[2].mxu1 }
 0x1d1   : > { %v469_v29 = vsub.f32 %v461_v24, %v467_v23  ;;  %v464_v30 = vadd.f32 %v567_v21, %v463_v27  ;;  %v610_v31 = vpop.f32.mrb[3].mxu1 }
 0x1d3   : > { %v472_v32 = vmul.f32 %v471_v26, %v469_v29  ;;  %v470_v33 = vsub.f32 %v464_v30, %v468_v28 }
 0x1d5   : > { %v474_v34 = vadd.f32 %v472_v32, %v467_v23  ;;  %v473_v35 = vmul.f32 %v471_v26, %v470_v33 }
 0x1d7   : > { %477 = vst.msk [vmem:[%s277_s15] sm:$0xff] %vm476_vm3, %v474_v34  ;;  %v475_v36 = vadd.f32 %v473_v35, %v468_v28 }
 0x1d9   : > { %478 = vst.msk [vmem:[%s277_s15 + $0x8] sm:$0xff] %vm476_vm3, %v475_v36 }
 0x1da PF: > { %s18_s26 = sadd.s32 1, %s637_s26  }
 0x1db   : > { %p15_p4 = scmp.ge.s32.totalorder %s18_s26, 5  }
 0x1dd   :  { %17 = sbr.rel (!%p15_p4) target bundleno = 2 (0x2), region = 77 }

</bundles_post_ra>
